<compile_context>
chip_gen: v5e
topology: v5e:2x2
jax: 0.10.0
libtpu: 0.0.40
codegen_flags: <defaults>
</compile_context>

<pallas_src>
import jax
import jax.numpy as jnp
from jax.experimental import pallas as pl
from jax.experimental.pallas import tpu as pltpu

MAX_TILE_B = 2048          # batch-tile cap: ~21 MiB working set, fits v7x's 64 MiB VMEM
MEGACORE_MIN_BATCH = 1024  # force >=2 (even) grid steps above this so v7x uses both TCs
HID1, HID2_PAD, HID3_PAD = 256, 128, 128   # fc2/fc3 widths zero-padded to full lanes


def _round_up(x, m):
    return (x + m - 1) // m * m


def _cdiv(a, b):
    return (a + b - 1) // b


def _choose_tile(B):
    """Pick (tile_b, grid) minimizing padding while amortizing per-step overhead."""
    n_steps = _cdiv(B, MAX_TILE_B)
    if B >= MEGACORE_MIN_BATCH:
        n_steps = max(n_steps, 2)
        n_steps = _round_up(n_steps, 2)        # balanced split across v7x's 2 TCs
    if n_steps == 1:
        return B, 1                            # single full-array block: always legal
    tile_b = _round_up(_cdiv(B, n_steps), 16)  # sublane-aligned, minimal tail padding
    return tile_b, _cdiv(B, tile_b)


def _mlp_kernel(x_ref,
                w1_ref, b1_ref,
                w2_ref, b2_ref,
                w3_ref, b3_ref,
                w4_ref, b4_ref,
                o_ref):
    # Cast x f32 -> bf16 in-kernel (hidden under the x DMA), accumulate in f32 on MXU.
    x = x_ref[...].astype(jnp.bfloat16)
    # fc1 + ReLU
    h = jnp.dot(x, w1_ref[...], preferred_element_type=jnp.float32)
    h = jnp.maximum(h + b1_ref[...], 0.0)
    # fc2 + ReLU (output lanes padded to 128; padded cols are exactly zero)
    h = jnp.dot(h.astype(jnp.bfloat16), w2_ref[...], preferred_element_type=jnp.float32)
    h = jnp.maximum(h + b2_ref[...], 0.0)
    # fc3 + ReLU (128 in / 128 out, zero-padded)
    h = jnp.dot(h.astype(jnp.bfloat16), w3_ref[...], preferred_element_type=jnp.float32)
    h = jnp.maximum(h + b3_ref[...], 0.0)
    # clf (no activation) — lane-padded classifier
    out = jnp.dot(h.astype(jnp.bfloat16), w4_ref[...], preferred_element_type=jnp.float32)
    o_ref[...] = (out + b4_ref[...]).astype(o_ref.dtype)


@jax.jit
def mlp_forward(x, params):
    """x: (B, 1, 28, 28) float32 NCHW.  Returns (B, n_classes) float32 logits."""
    (w1, b1), (w2, b2), (w3, b3), (w4, b4) = params
    B = x.shape[0]
    n_classes = w4.shape[1]
    n_out_pad = _round_up(max(n_classes, 1), 128)

    # Flatten like x.view(-1, 784); keep f32 (bf16 cast happens inside the kernel).
    x2d = x.reshape(B, 784)

    tile_b, grid_b = _choose_tile(B)

    # Zero-pad hidden/classifier widths to full 128-lane vregs; cast weights to bf16.
    def pad2(w, rows, cols):
        return jnp.pad(w, ((0, rows - w.shape[0]), (0, cols - w.shape[1])))

    w1b = w1.astype(jnp.bfloat16)                                   # (784, 256)
    w2b = pad2(w2, HID1, HID2_PAD).astype(jnp.bfloat16)             # (256, 128)
    w3b = pad2(w3, HID2_PAD, HID3_PAD).astype(jnp.bfloat16)         # (128, 128)
    w4b = pad2(w4, HID3_PAD, n_out_pad).astype(jnp.bfloat16)        # (128, n_out_pad)
    b1r = b1.reshape(1, -1).astype(jnp.float32)
    b2r = jnp.pad(b2, (0, HID2_PAD - b2.shape[0])).reshape(1, -1).astype(jnp.float32)
    b3r = jnp.pad(b3, (0, HID3_PAD - b3.shape[0])).reshape(1, -1).astype(jnp.float32)
    b4r = jnp.pad(b4, (0, n_out_pad - b4.shape[0])).reshape(1, -1).astype(jnp.float32)

    def resident(a):
        # Full-array block, constant index map: fetched once, VMEM-resident across steps.
        nd = a.ndim
        return pl.BlockSpec(a.shape, lambda i, _nd=nd: (0,) * _nd)

    weight_elems = 784 * HID1 + HID1 * HID2_PAD + HID2_PAD * HID3_PAD + HID3_PAD * n_out_pad
    flops = 2 * B * weight_elems
    bytes_accessed = (B * 784 * 4                                      # x (f32 stream)
                      + weight_elems * 2                               # weights (bf16)
                      + (HID1 + HID2_PAD + HID3_PAD + n_out_pad) * 4   # biases (f32)
                      + B * n_out_pad * 4)                             # output (f32)

    out = pl.pallas_call(
        _mlp_kernel,
        out_shape=jax.ShapeDtypeStruct((B, n_out_pad), jnp.float32),
        grid=(grid_b,),
        in_specs=[pl.BlockSpec((tile_b, 784), lambda i: (i, 0)),
                  resident(w1b), resident(b1r),
                  resident(w2b), resident(b2r),
                  resident(w3b), resident(b3r),
                  resident(w4b), resident(b4r)],
        out_specs=pl.BlockSpec((tile_b, n_out_pad), lambda i: (i, 0)),
        compiler_params=pltpu.CompilerParams(
            dimension_semantics=("parallel",),
            vmem_limit_bytes=48 << 20),
        cost_estimate=pl.CostEstimate(flops=flops,
                                      transcendentals=0,
                                      bytes_accessed=bytes_accessed),
    )(x2d, w1b, b1r, w2b, b2r, w3b, b3r, w4b, b4r)

    # Lane-slice back to n_classes (consumer could equally take the padded block).
    return out[:, :n_classes]


def init_params(key, n_classes=10):
    """Deterministic init mirroring the nn.Linear shapes of the PyTorch module.

    PyTorch stores weights as (out, in); we store the transpose (in, out) so the
    kernel does x @ W directly.
    """
    dims = [(784, 256), (256, 64), (64, 16), (16, n_classes)]
    params = []
    for fan_in, fan_out in dims:
        key, kw, kb = jax.random.split(key, 3)
        bound = 1.0 / jnp.sqrt(fan_in)            # PyTorch default U(-1/sqrt(in), 1/sqrt(in))
        w = jax.random.uniform(kw, (fan_in, fan_out), jnp.float32, -bound, bound)
        b = jax.random.uniform(kb, (fan_out,), jnp.float32, -bound, bound)
        params.append((w, b))
    return params


def mlp_reference_matched(x, params):
    """Pure-JAX reference with the same bf16-operand / f32-accumulate recipe."""
    (w1, b1), (w2, b2), (w3, b3), (w4, b4) = params
    h = x.reshape(x.shape[0], 784).astype(jnp.bfloat16)
    h = jax.nn.relu(jnp.dot(h, w1.astype(jnp.bfloat16),
                            preferred_element_type=jnp.float32) + b1)
    h = jax.nn.relu(jnp.dot(h.astype(jnp.bfloat16), w2.astype(jnp.bfloat16),
                            preferred_element_type=jnp.float32) + b2)
    h = jax.nn.relu(jnp.dot(h.astype(jnp.bfloat16), w3.astype(jnp.bfloat16),
                            preferred_element_type=jnp.float32) + b3)
    return jnp.dot(h.astype(jnp.bfloat16), w4.astype(jnp.bfloat16),
                   preferred_element_type=jnp.float32) + b4


def mlp_reference_f32(x, params):
    """Pure-f32 reference of the PyTorch forward (loose sanity check)."""
    (w1, b1), (w2, b2), (w3, b3), (w4, b4) = params
    h = x.reshape(x.shape[0], 784)
    h = jax.nn.relu(h @ w1 + b1)
    h = jax.nn.relu(h @ w2 + b2)
    h = jax.nn.relu(h @ w3 + b3)
    return h @ w4 + b4


if __name__ == "__main__":
    key = jax.random.PRNGKey(0)
    kx, kp = jax.random.split(key)

    B, n_classes = 2, 10
    x = jax.random.normal(kx, (B, 1, 28, 28), jnp.float32)   # NCHW, like MNIST
    params = init_params(kp, n_classes=n_classes)

    out = mlp_forward(x, params)
    out = jax.block_until_ready(out)
    assert out.shape == (B, n_classes), out.shape

    # Tight check vs a reference that uses the same bf16/f32 mixed-precision recipe.
    ref_m = mlp_reference_matched(x, params)
    assert jnp.allclose(out, ref_m, atol=5e-3, rtol=5e-3), "mismatch vs matched-precision reference"

    # Loose sanity check vs the pure-f32 PyTorch-equivalent forward (bf16 rounding).
    ref_f = mlp_reference_f32(x, params)
    assert jnp.allclose(out, ref_f, atol=2.5e-1, rtol=2.5e-1), "mismatch vs f32 reference"

    print("KERNEL_OK")
</pallas_src>

<mosaic_0001>
module attributes {stable_mosaic.version = 11 : i64} {
  func.func @_mlp_kernel(%arg0: i32, %arg1: memref<2x784xf32, #tpu.memory_space<vmem>>, %arg2: memref<784x256xbf16, #tpu.memory_space<vmem>>, %arg3: memref<1x256xf32, #tpu.memory_space<vmem>>, %arg4: memref<256x128xbf16, #tpu.memory_space<vmem>>, %arg5: memref<1x128xf32, #tpu.memory_space<vmem>>, %arg6: memref<128x128xbf16, #tpu.memory_space<vmem>>, %arg7: memref<1x128xf32, #tpu.memory_space<vmem>>, %arg8: memref<128x128xbf16, #tpu.memory_space<vmem>>, %arg9: memref<1x128xf32, #tpu.memory_space<vmem>>, %arg10: memref<2x128xf32, #tpu.memory_space<vmem>>) attributes {dimension_semantics = [#tpu.dimension_semantics<parallel>], iteration_bounds = array<i64: 1>, scalar_prefetch = 0 : i64, scratch_operands = 0 : i64, tpu.core_type = #tpu.core_type<tc>, window_params = [{transform_indices = @transform_0, window_bounds = array<i64: 2, 784>}, {pipeline_mode = #tpu.pipeline_mode<synchronous>, transform_indices = @transform_1, window_bounds = array<i64: 784, 256>}, {pipeline_mode = #tpu.pipeline_mode<synchronous>, transform_indices = @transform_2, window_bounds = array<i64: 1, 256>}, {pipeline_mode = #tpu.pipeline_mode<synchronous>, transform_indices = @transform_3, window_bounds = array<i64: 256, 128>}, {pipeline_mode = #tpu.pipeline_mode<synchronous>, transform_indices = @transform_4, window_bounds = array<i64: 1, 128>}, {pipeline_mode = #tpu.pipeline_mode<synchronous>, transform_indices = @transform_5, window_bounds = array<i64: 128, 128>}, {pipeline_mode = #tpu.pipeline_mode<synchronous>, transform_indices = @transform_6, window_bounds = array<i64: 1, 128>}, {pipeline_mode = #tpu.pipeline_mode<synchronous>, transform_indices = @transform_7, window_bounds = array<i64: 128, 128>}, {pipeline_mode = #tpu.pipeline_mode<synchronous>, transform_indices = @transform_8, window_bounds = array<i64: 1, 128>}, {transform_indices = @transform_9, window_bounds = array<i64: 2, 128>}]} {
    %c0 = arith.constant 0 : index
    %c0_0 = arith.constant 0 : index
    %0 = vector.load %arg1[%c0, %c0_0] : memref<2x784xf32, #tpu.memory_space<vmem>>, vector<2x784xf32>
    %1 = arith.truncf %0 : vector<2x784xf32> to vector<2x784xbf16>
    %c0_1 = arith.constant 0 : index
    %c0_2 = arith.constant 0 : index
    %2 = vector.load %arg2[%c0_1, %c0_2] : memref<784x256xbf16, #tpu.memory_space<vmem>>, vector<784x256xbf16>
    %cst = arith.constant dense<0.000000e+00> : vector<2x256xf32>
    %3 = tpu.matmul %1, %2, %cst {dimension_numbers = #tpu.dot_dimension_numbers<[1], [0], [0], [1], [0, 0, 1, 1], [], []>} : vector<2x784xbf16>, vector<784x256xbf16>, vector<2x256xf32> -> vector<2x256xf32>
    %c0_3 = arith.constant 0 : index
    %c0_4 = arith.constant 0 : index
    %4 = vector.load %arg3[%c0_3, %c0_4] : memref<1x256xf32, #tpu.memory_space<vmem>>, vector<1x256xf32>
    %5 = vector.broadcast %4 : vector<1x256xf32> to vector<2x256xf32>
    %6 = arith.addf %3, %5 : vector<2x256xf32>
    %cst_5 = arith.constant 0.000000e+00 : f32
    %7 = vector.broadcast %cst_5 : f32 to vector<2x256xf32>
    %8 = arith.maximumf %6, %7 : vector<2x256xf32>
    %9 = arith.truncf %8 : vector<2x256xf32> to vector<2x256xbf16>
    %c0_6 = arith.constant 0 : index
    %c0_7 = arith.constant 0 : index
    %10 = vector.load %arg4[%c0_6, %c0_7] : memref<256x128xbf16, #tpu.memory_space<vmem>>, vector<256x128xbf16>
    %cst_8 = arith.constant dense<0.000000e+00> : vector<2x128xf32>
    %11 = tpu.matmul %9, %10, %cst_8 {dimension_numbers = #tpu.dot_dimension_numbers<[1], [0], [0], [1], [0, 0, 1, 1], [], []>} : vector<2x256xbf16>, vector<256x128xbf16>, vector<2x128xf32> -> vector<2x128xf32>
    %c0_9 = arith.constant 0 : index
    %c0_10 = arith.constant 0 : index
    %12 = vector.load %arg5[%c0_9, %c0_10] : memref<1x128xf32, #tpu.memory_space<vmem>>, vector<1x128xf32>
    %13 = vector.broadcast %12 : vector<1x128xf32> to vector<2x128xf32>
    %14 = arith.addf %11, %13 : vector<2x128xf32>
    %cst_11 = arith.constant 0.000000e+00 : f32
    %15 = vector.broadcast %cst_11 : f32 to vector<2x128xf32>
    %16 = arith.maximumf %14, %15 : vector<2x128xf32>
    %17 = arith.truncf %16 : vector<2x128xf32> to vector<2x128xbf16>
    %c0_12 = arith.constant 0 : index
    %c0_13 = arith.constant 0 : index
    %18 = vector.load %arg6[%c0_12, %c0_13] : memref<128x128xbf16, #tpu.memory_space<vmem>>, vector<128x128xbf16>
    %cst_14 = arith.constant dense<0.000000e+00> : vector<2x128xf32>
    %19 = tpu.matmul %17, %18, %cst_14 {dimension_numbers = #tpu.dot_dimension_numbers<[1], [0], [0], [1], [0, 0, 1, 1], [], []>} : vector<2x128xbf16>, vector<128x128xbf16>, vector<2x128xf32> -> vector<2x128xf32>
    %c0_15 = arith.constant 0 : index
    %c0_16 = arith.constant 0 : index
    %20 = vector.load %arg7[%c0_15, %c0_16] : memref<1x128xf32, #tpu.memory_space<vmem>>, vector<1x128xf32>
    %21 = vector.broadcast %20 : vector<1x128xf32> to vector<2x128xf32>
    %22 = arith.addf %19, %21 : vector<2x128xf32>
    %cst_17 = arith.constant 0.000000e+00 : f32
    %23 = vector.broadcast %cst_17 : f32 to vector<2x128xf32>
    %24 = arith.maximumf %22, %23 : vector<2x128xf32>
    %25 = arith.truncf %24 : vector<2x128xf32> to vector<2x128xbf16>
    %c0_18 = arith.constant 0 : index
    %c0_19 = arith.constant 0 : index
    %26 = vector.load %arg8[%c0_18, %c0_19] : memref<128x128xbf16, #tpu.memory_space<vmem>>, vector<128x128xbf16>
    %cst_20 = arith.constant dense<0.000000e+00> : vector<2x128xf32>
    %27 = tpu.matmul %25, %26, %cst_20 {dimension_numbers = #tpu.dot_dimension_numbers<[1], [0], [0], [1], [0, 0, 1, 1], [], []>} : vector<2x128xbf16>, vector<128x128xbf16>, vector<2x128xf32> -> vector<2x128xf32>
    %c0_21 = arith.constant 0 : index
    %c0_22 = arith.constant 0 : index
    %28 = vector.load %arg9[%c0_21, %c0_22] : memref<1x128xf32, #tpu.memory_space<vmem>>, vector<1x128xf32>
    %29 = vector.broadcast %28 : vector<1x128xf32> to vector<2x128xf32>
    %30 = arith.addf %27, %29 : vector<2x128xf32>
    %c0_23 = arith.constant 0 : index
    %c0_24 = arith.constant 0 : index
    %31 = vector.load %arg10[%c0_23, %c0_24] : memref<2x128xf32, #tpu.memory_space<vmem>>, vector<2x128xf32>
    tpu.vector_store %arg10[%c0_23, %c0_24], %30 {strides = array<i32>} : memref<2x128xf32, #tpu.memory_space<vmem>>, vector<2x128xf32>,
    return
  }
  func.func @transform_0(%arg0: i32) -> (i32, i32) {
    %c0_i32 = arith.constant 0 : i32
    %c0_i32_0 = arith.constant 0 : i32
    return %arg0, %c0_i32 : i32, i32
  }
  func.func @transform_1(%arg0: i32) -> (i32, i32) {
    %c0_i32 = arith.constant 0 : i32
    %c0_i32_0 = arith.constant 0 : i32
    %c0_i32_1 = arith.constant 0 : i32
    return %c0_i32, %c0_i32_0 : i32, i32
  }
  func.func @transform_2(%arg0: i32) -> (i32, i32) {
    %c0_i32 = arith.constant 0 : i32
    %c0_i32_0 = arith.constant 0 : i32
    %c0_i32_1 = arith.constant 0 : i32
    return %c0_i32, %c0_i32_0 : i32, i32
  }
  func.func @transform_3(%arg0: i32) -> (i32, i32) {
    %c0_i32 = arith.constant 0 : i32
    %c0_i32_0 = arith.constant 0 : i32
    %c0_i32_1 = arith.constant 0 : i32
    return %c0_i32, %c0_i32_0 : i32, i32
  }
  func.func @transform_4(%arg0: i32) -> (i32, i32) {
    %c0_i32 = arith.constant 0 : i32
    %c0_i32_0 = arith.constant 0 : i32
    %c0_i32_1 = arith.constant 0 : i32
    return %c0_i32, %c0_i32_0 : i32, i32
  }
  func.func @transform_5(%arg0: i32) -> (i32, i32) {
    %c0_i32 = arith.constant 0 : i32
    %c0_i32_0 = arith.constant 0 : i32
    %c0_i32_1 = arith.constant 0 : i32
    return %c0_i32, %c0_i32_0 : i32, i32
  }
  func.func @transform_6(%arg0: i32) -> (i32, i32) {
    %c0_i32 = arith.constant 0 : i32
    %c0_i32_0 = arith.constant 0 : i32
    %c0_i32_1 = arith.constant 0 : i32
    return %c0_i32, %c0_i32_0 : i32, i32
  }
  func.func @transform_7(%arg0: i32) -> (i32, i32) {
    %c0_i32 = arith.constant 0 : i32
    %c0_i32_0 = arith.constant 0 : i32
    %c0_i32_1 = arith.constant 0 : i32
    return %c0_i32, %c0_i32_0 : i32, i32
  }
  func.func @transform_8(%arg0: i32) -> (i32, i32) {
    %c0_i32 = arith.constant 0 : i32
    %c0_i32_0 = arith.constant 0 : i32
    %c0_i32_1 = arith.constant 0 : i32
    return %c0_i32, %c0_i32_0 : i32, i32
  }
  func.func @transform_9(%arg0: i32) -> (i32, i32) {
    %c0_i32 = arith.constant 0 : i32
    %c0_i32_0 = arith.constant 0 : i32
    return %arg0, %c0_i32 : i32, i32
  }
}

</mosaic_0001>

<bundles_post_ra>
// kernel: mlp_forward.1
= control target key start
LH: loop header
LB: loop body
LE: loop exit
PB: predicated region body
PF: predicated region fallthrough
CT: control target
= control target key end

     0   :  { %vm656_vm0 = vcmask 130048   ;;  %s2655_s0 = inlined_call_operand.vmem [shape: f32[2,784], index: 0, kind: input, shape index: {}]   ;;  %s2656_s1 = inlined_call_operand.vmem [shape: bf16[784,256], index: 1, kind: input, shape index: {}]   ;;  %s2657_s2 = inlined_call_operand.vmem [shape: f32[1,256], index: 2, kind: input, shape index: {}]   ;;  %s2658_s3 = inlined_call_operand.vmem [shape: bf16[256,128], index: 3, kind: input, shape index: {}]   ;;  %s2659_s4 = inlined_call_operand.vmem [shape: f32[1,128], index: 4, kind: input, shape index: {}]   ;;  %s2660_s5 = inlined_call_operand.vmem [shape: bf16[128,128], index: 5, kind: input, shape index: {}]   ;;  %s2661_s6 = inlined_call_operand.vmem [shape: f32[1,128], index: 6, kind: input, shape index: {}]   ;;  %s2662_s7 = inlined_call_operand.vmem [shape: bf16[128,128], index: 7, kind: input, shape index: {}]   ;;  %s2663_s8 = inlined_call_operand.vmem [shape: f32[1,128], index: 8, kind: input, shape index: {}]   ;;  %s2664_s9 = inlined_call_operand.hbm [shape: f32[2,128], index: 9, kind: output, shape index: {}]  }
   0x1   :  { %v1245_v0 = vld [vmem:[%s2656_s1 + $0x70] sm:$0xf]  ;;  %v1724_v1 = vld [vmem:[%s2656_s1 + $0x74] sm:$0xf0]  ;;  %v1237_v11 = vld [vmem:[%s2656_s1 + $0x60] sm:$0xf] }
   0x2   :  { %v1373_v2 = vld [vmem:[%s2656_s1 + $0x170] sm:$0xf]  ;;  %v1246_v3 = vor.u32 %v1724_v1, %v1245_v0  ;;  %v1756_v4 = vld [vmem:[%s2656_s1 + $0x174] sm:$0xf0]  ;;  %v1722_v13 = vld [vmem:[%s2656_s1 + $0x64] sm:$0xf0] }
   0x3   :  { %v1437_v5 = vld [vmem:[%s2656_s1 + $0x1f0] sm:$0xf]  ;;  %v1772_v6 = vld [vmem:[%s2656_s1 + $0x1f4] sm:$0xf0]  ;;  %v1374_v7 = vor.u32 %v1756_v4, %v1373_v2  ;;  %v1365_v14 = vld [vmem:[%s2656_s1 + $0x160] sm:$0xf]  ;;  %v1238_v16 = vor.u32 %v1722_v13, %v1237_v11 }
   0x4   :  { %v1438_v8 = vor.u32 %v1772_v6, %v1437_v5  ;;  %v1309_v9 = vld [vmem:[%s2656_s1 + $0xf0] sm:$0xf]  ;;  %v1740_v10 = vld [vmem:[%s2656_s1 + $0xf4] sm:$0xf0]  ;;  %660 = vmatpush.bf16.msra.mxu0 %v1246_v3  ;;  %v1754_v15 = vld [vmem:[%s2656_s1 + $0x164] sm:$0xf0] }
   0x5   :  { %v1310_v12 = vor.u32 %v1740_v10, %v1309_v9  ;;  %686 = vmatpush.bf16.msra.mxu2 %v1374_v7  ;;  %v1366_v17 = vor.u32 %v1754_v15, %v1365_v14  ;;  %v1429_v18 = vld [vmem:[%s2656_s1 + $0x1e0] sm:$0xf]  ;;  %v1770_v19 = vld [vmem:[%s2656_s1 + $0x1e4] sm:$0xf0]  ;;  %v1229_v23 = vld [vmem:[%s2656_s1 + $0x50] sm:$0xf] }
   0x6   :  { %699 = vmatpush.bf16.msra.mxu3 %v1438_v8  ;;  %v1301_v20 = vld [vmem:[%s2656_s1 + $0xe0] sm:$0xf]  ;;  %v1430_v21 = vor.u32 %v1770_v19, %v1429_v18  ;;  %v1738_v22 = vld [vmem:[%s2656_s1 + $0xe4] sm:$0xf0]  ;;  %v1720_v24 = vld [vmem:[%s2656_s1 + $0x54] sm:$0xf0] }
   0x7   :  { %673 = vmatpush.bf16.msra.mxu1 %v1310_v12  ;;  %v1302_v25 = vor.u32 %v1738_v22, %v1301_v20  ;;  %v1357_v26 = vld [vmem:[%s2656_s1 + $0x150] sm:$0xf]  ;;  %v1752_v27 = vld [vmem:[%s2656_s1 + $0x154] sm:$0xf0]  ;;  %v1230_v29 = vor.u32 %v1720_v24, %v1229_v23  ;;  %v1221_v35 = vld [vmem:[%s2656_s1 + $0x40] sm:$0xf] }
   0x8   :  { %v1421_v28 = vld [vmem:[%s2656_s1 + $0x1d0] sm:$0xf]  ;;  %661 = vmatpush.bf16.msra.mxu0 %v1238_v16  ;;  %v1768_v30 = vld [vmem:[%s2656_s1 + $0x1d4] sm:$0xf0]  ;;  %v1358_v33 = vor.u32 %v1752_v27, %v1357_v26  ;;  %v1718_v36 = vld [vmem:[%s2656_s1 + $0x44] sm:$0xf0] }
   0x9   :  { %v1293_v31 = vld [vmem:[%s2656_s1 + $0xd0] sm:$0xf]  ;;  %v1736_v32 = vld [vmem:[%s2656_s1 + $0xd4] sm:$0xf0]  ;;  %687 = vmatpush.bf16.msra.mxu2 %v1366_v17  ;;  %v1422_v34 = vor.u32 %v1768_v30, %v1421_v28  ;;  %v1349_v37 = vld [vmem:[%s2656_s1 + $0x140] sm:$0xf]  ;;  %v1222_v44 = vor.u32 %v1718_v36, %v1221_v35 }
   0xa   :  { %700 = vmatpush.bf16.msra.mxu3 %v1430_v21  ;;  %v1294_v38 = vor.u32 %v1736_v32, %v1293_v31  ;;  %v1750_v39 = vld [vmem:[%s2656_s1 + $0x144] sm:$0xf0]  ;;  %v1413_v40 = vld [vmem:[%s2656_s1 + $0x1c0] sm:$0xf]  ;;  %v1213_v47 = vld [vmem:[%s2656_s1 + $0x30] sm:$0xf] }
   0xb   :  { %674 = vmatpush.bf16.msra.mxu1 %v1302_v25  ;;  %v1766_v41 = vld [vmem:[%s2656_s1 + $0x1c4] sm:$0xf0]  ;;  %v1285_v42 = vld [vmem:[%s2656_s1 + $0xc0] sm:$0xf]  ;;  %v1350_v45 = vor.u32 %v1750_v39, %v1349_v37  ;;  %v1716_v48 = vld [vmem:[%s2656_s1 + $0x34] sm:$0xf0] }
   0xc   :  { %v1734_v43 = vld [vmem:[%s2656_s1 + $0xc4] sm:$0xf0]  ;;  %662 = vmatpush.bf16.msra.mxu0 %v1230_v29  ;;  %v1414_v46 = vor.u32 %v1766_v41, %v1413_v40  ;;  %v1341_v49 = vld [vmem:[%s2656_s1 + $0x130] sm:$0xf]  ;;  %v1748_v51 = vld [vmem:[%s2656_s1 + $0x134] sm:$0xf0]  ;;  %v1214_v56 = vor.u32 %v1716_v48, %v1213_v47 }
   0xd   :  { %688 = vmatpush.bf16.msra.mxu2 %v1358_v33  ;;  %v1286_v50 = vor.u32 %v1734_v43, %v1285_v42  ;;  %v1405_v52 = vld [vmem:[%s2656_s1 + $0x1b0] sm:$0xf]  ;;  %v1764_v53 = vld [vmem:[%s2656_s1 + $0x1b4] sm:$0xf0]  ;;  %v1342_v57 = vor.u32 %v1748_v51, %v1341_v49  ;;  %v1205_v59 = vld [vmem:[%s2656_s1 + $0x20] sm:$0xf] }
   0xe   :  { %701 = vmatpush.bf16.msra.mxu3 %v1422_v34  ;;  %v1277_v54 = vld [vmem:[%s2656_s1 + $0xb0] sm:$0xf]  ;;  %v1732_v55 = vld [vmem:[%s2656_s1 + $0xb4] sm:$0xf0]  ;;  %v1406_v58 = vor.u32 %v1764_v53, %v1405_v52  ;;  %v1714_v60 = vld [vmem:[%s2656_s1 + $0x24] sm:$0xf0] }
   0xf   :  { %675 = vmatpush.bf16.msra.mxu1 %v1294_v38  ;;  %v1333_v61 = vld [vmem:[%s2656_s1 + $0x120] sm:$0xf]  ;;  %v1278_v62 = vor.u32 %v1732_v55, %v1277_v54  ;;  %v1746_v63 = vld [vmem:[%s2656_s1 + $0x124] sm:$0xf0]  ;;  %v1206_v4 = vor.u32 %v1714_v60, %v1205_v59  ;;  %v1197_v5 = vld [vmem:[%s2656_s1 + $0x10] sm:$0xf] }
  0x10   :  { %663 = vmatpush.bf16.msra.mxu0 %v1222_v44  ;;  %v1397_v0 = vld [vmem:[%s2656_s1 + $0x1a0] sm:$0xf]  ;;  %v1762_v1 = vld [vmem:[%s2656_s1 + $0x1a4] sm:$0xf0]  ;;  %v1712_v6 = vld [vmem:[%s2656_s1 + $0x14] sm:$0xf0]  ;;  %v1334_v7 = vor.u32 %v1746_v63, %v1333_v61 }
  0x11   :  { %689 = vmatpush.bf16.msra.mxu2 %v1350_v45  ;;  %v1269_v2 = vld [vmem:[%s2656_s1 + $0xa0] sm:$0xf]  ;;  %v1730_v3 = vld [vmem:[%s2656_s1 + $0xa4] sm:$0xf0]  ;;  %v1398_v8 = vor.u32 %v1762_v1, %v1397_v0  ;;  %v1325_v9 = vld [vmem:[%s2656_s1 + $0x110] sm:$0xf]  ;;  %v1198_v19 = vor.u32 %v1712_v6, %v1197_v5 }
  0x12   :  { %702 = vmatpush.bf16.msra.mxu3 %v1414_v46  ;;  %v1744_v10 = vld [vmem:[%s2656_s1 + $0x114] sm:$0xf0]  ;;  %v1389_v11 = vld [vmem:[%s2656_s1 + $0x190] sm:$0xf]  ;;  %v1270_v12 = vor.u32 %v1730_v3, %v1269_v2  ;;  %v1189_v16 = vld [vmem:[%s2656_s1] sm:$0xf] }
  0x13   :  { %676 = vmatpush.bf16.msra.mxu1 %v1286_v50  ;;  %v1760_v13 = vld [vmem:[%s2656_s1 + $0x194] sm:$0xf0]  ;;  %v1261_v14 = vld [vmem:[%s2656_s1 + $0x90] sm:$0xf]  ;;  %v1710_v17 = vld [vmem:[%s2656_s1 + $0x4] sm:$0xf0]  ;;  %v1326_v22 = vor.u32 %v1744_v10, %v1325_v9 }
  0x14   :  { %664 = vmatpush.bf16.msra.mxu0 %v1214_v56  ;;  %v1728_v15 = vld [vmem:[%s2656_s1 + $0x94] sm:$0xf0]  ;;  %v34_v18 = vld [vmem:[%s2655_s0] sm:$0xff]  ;;  %v1742_v21 = vld [vmem:[%s2656_s1 + $0x104] sm:$0xf0]  ;;  %v1390_v23 = vor.u32 %v1760_v13, %v1389_v11  ;;  %v1190_v34 = vor.u32 %v1710_v17, %v1189_v16 }
  0x15   :  { %690 = vmatpush.bf16.msra.mxu2 %v1342_v57  ;;  %v1317_v20 = vld [vmem:[%s2656_s1 + $0x100] sm:$0xf]  ;;  %38 = vst [vmem:[#allocation1] ss:$4 sm:$0xff] %v34_v18  ;;  %v1758_v25 = vld [vmem:[%s2656_s1 + $0x184] sm:$0xf0]  ;;  %v1262_v27 = vor.u32 %v1728_v15, %v1261_v14 }
  0x16   :  { %703 = vmatpush.bf16.msra.mxu3 %v1406_v58  ;;  %v1381_v24 = vld [vmem:[%s2656_s1 + $0x180] sm:$0xf]  ;;  %v1501_v26 = vld [vmem:[%s2656_s1 + $0x270] sm:$0xf]  ;;  %v1788_v28 = vld [vmem:[%s2656_s1 + $0x274] sm:$0xf0]  ;;  %v1318_v38 = vor.u32 %v1742_v21, %v1317_v20 }
  0x17   :  { %677 = vmatpush.bf16.msra.mxu1 %v1278_v62  ;;  %v1723_v29 = vld [vmem:[%s2656_s1 + $0x74] sm:$0xf]  ;;  %v1247_v30 = vld [vmem:[%s2656_s1 + $0x78] sm:$0xf0]  ;;  %v1253_v31 = vld [vmem:[%s2656_s1 + $0x80] sm:$0xf]  ;;  %v1382_v39 = vor.u32 %v1758_v25, %v1381_v24  ;;  %v1502_v43 = vor.u32 %v1788_v28, %v1501_v26 }
  0x18   :  { %665 = vmatpush.bf16.msra.mxu0 %v1206_v4  ;;  %v1726_v32 = vld [vmem:[%s2656_s1 + $0x84] sm:$0xf0]  ;;  %v1565_v33 = vld [vmem:[%s2656_s1 + $0x2f0] sm:$0xf]  ;;  %v1804_v35 = vld [vmem:[%s2656_s1 + $0x2f4] sm:$0xf0]  ;;  %v1250_v44 = vor.u32 %v1723_v29, %v1247_v30 }
  0x19   :  { %691 = vmatpush.bf16.msra.mxu2 %v1334_v7  ;;  %v1573_v36 = vld [vmem:[%s2656_s1 + $0x300] sm:$0xf]  ;;  %v1806_v37 = vld [vmem:[%s2656_s1 + $0x304] sm:$0xf0]  ;;  %v1739_v40 = vld [vmem:[%s2656_s1 + $0xf4] sm:$0xf]  ;;  %v1254_v48 = vor.u32 %v1726_v32, %v1253_v31  ;;  %v1566_v53 = vor.u32 %v1804_v35, %v1565_v33 }
  0x1a   :  { %704 = vmatpush.bf16.msra.mxu3 %v1398_v8  ;;  %v1311_v41 = vld [vmem:[%s2656_s1 + $0xf8] sm:$0xf0]  ;;  %v1493_v42 = vld [vmem:[%s2656_s1 + $0x260] sm:$0xf]  ;;  %v1786_v45 = vld [vmem:[%s2656_s1 + $0x264] sm:$0xf0]  ;;  %v1574_v50 = vor.u32 %v1806_v37, %v1573_v36 }
  0x1b   :  { %678 = vmatpush.bf16.msra.mxu1 %v1270_v12  ;;  %v1721_v46 = vld [vmem:[%s2656_s1 + $0x64] sm:$0xf]  ;;  %v1239_v47 = vld [vmem:[%s2656_s1 + $0x68] sm:$0xf0]  ;;  %v1557_v54 = vld [vmem:[%s2656_s1 + $0x2e0] sm:$0xf]  ;;  %v1314_v56 = vor.u32 %v1739_v40, %v1311_v41  ;;  %v1494_v60 = vor.u32 %v1786_v45, %v1493_v42 }
  0x1c   :  { %666 = vmatpush.bf16.msra.mxu0 %v1198_v19  ;;  %v43_v49 = vld.sshfl [vmem:[#allocation1 + $0x10] sm:$0xff pattern:$0x73625140]  ;;  %v41_v51 = vld.sshfl [vmem:[#allocation1] sm:$0xff pattern:$0x73625140]  ;;  %v1242_v61 = vor.u32 %v1721_v46, %v1239_v47 }
  0x1d   :  { %692 = vmatpush.bf16.msra.mxu2 %v1326_v22  ;;  %v2157_v52 = vpack.c.bf16 %v43_v49, %v43_v49  ;;  %v44_v55 = vld.sshfl [vmem:[#allocation1 + $0x18] sm:$0xff pattern:$0x73625140]  ;;  %v1802_v57 = vld [vmem:[%s2656_s1 + $0x2e4] sm:$0xf0]  ;;  %v2165_v58 = vpack.c.bf16 %v41_v51, %v41_v51 }
  0x1e   :  { %705 = vmatpush.bf16.msra.mxu3 %v1390_v23  ;;  %v42_v59 = vld.sshfl [vmem:[#allocation1 + $0x8] sm:$0xff pattern:$0x73625140]  ;;  %v1737_v62 = vld [vmem:[%s2656_s1 + $0xe4] sm:$0xf]  ;;  %v2185_v4 = vpack.c.bf16 %v44_v55, %v44_v55  ;;  %v1558_v6 = vor.u32 %v1802_v57, %v1557_v54 }
  0x1f   :  { %679 = vmatpush.bf16.msra.mxu1 %v1262_v27  ;;  %v1303_v63 = vld [vmem:[%s2656_s1 + $0xe8] sm:$0xf0]  ;;  %v1485_v0 = vld [vmem:[%s2656_s1 + $0x250] sm:$0xf]  ;;  %v1784_v1 = vld [vmem:[%s2656_s1 + $0x254] sm:$0xf0]  ;;  %v2187_v5 = vpack.c.bf16 %v42_v59, %v42_v59 }
  0x20   :  { %667 = vmatpush.bf16.msra.mxu0 %v1190_v34  ;;  %v1719_v2 = vld [vmem:[%s2656_s1 + $0x54] sm:$0xf]  ;;  %v1231_v3 = vld [vmem:[%s2656_s1 + $0x58] sm:$0xf0]  ;;  %v1306_v7 = vor.u32 %v1737_v62, %v1303_v63  ;;  %v1549_v8 = vld [vmem:[%s2656_s1 + $0x2d0] sm:$0xf]  ;;  %v1486_v10 = vor.u32 %v1784_v1, %v1485_v0 }
  0x21   :  { %693 = vmatpush.bf16.msra.mxu2 %v1318_v38  ;;  %v1800_v9 = vld [vmem:[%s2656_s1 + $0x2d4] sm:$0xf0]  ;;  %v1234_v11 = vor.u32 %v1719_v2, %v1231_v3  ;;  %v1735_v12 = vld [vmem:[%s2656_s1 + $0xd4] sm:$0xf]  ;;  %v1295_v13 = vld [vmem:[%s2656_s1 + $0xd8] sm:$0xf0] }
  0x22   :  { %706 = vmatpush.bf16.msra.mxu3 %v1382_v39  ;;  %v1477_v14 = vld [vmem:[%s2656_s1 + $0x240] sm:$0xf]  ;;  %v1782_v15 = vld [vmem:[%s2656_s1 + $0x244] sm:$0xf0]  ;;  %v1717_v16 = vld [vmem:[%s2656_s1 + $0x44] sm:$0xf]  ;;  %v1550_v18 = vor.u32 %v1800_v9, %v1549_v8  ;;  %v1298_v19 = vor.u32 %v1735_v12, %v1295_v13 }
  0x23   :  { %680 = vmatpush.bf16.msra.mxu1 %v1254_v48  ;;  %668 = vmatmul.bf16.vlgmr.msra.gmra.mxu0 %v2165_v58  ;;  %v1223_v17 = vld [vmem:[%s2656_s1 + $0x48] sm:$0xf0]  ;;  %v1541_v20 = vld [vmem:[%s2656_s1 + $0x2c0] sm:$0xf]  ;;  %v1798_v21 = vld [vmem:[%s2656_s1 + $0x2c4] sm:$0xf0]  ;;  %v1478_v22 = vor.u32 %v1782_v15, %v1477_v14 }
  0x24   :  { %712 = vmatpush.bf16.msrb.mxu0 %v1502_v43  ;;  %694 = vmatmul.bf16.vlgmr.msra.gmra.mxu2 %v2157_v52  ;;  %v1226_v23 = vor.u32 %v1717_v16, %v1223_v17  ;;  %v1733_v24 = vld [vmem:[%s2656_s1 + $0xc4] sm:$0xf]  ;;  %v1287_v25 = vld [vmem:[%s2656_s1 + $0xc8] sm:$0xf0]  ;;  %v1469_v26 = vld [vmem:[%s2656_s1 + $0x230] sm:$0xf]  ;;  %v1542_v30 = vor.u32 %v1798_v21, %v1541_v20 }
  0x25   :  { %745 = vmatpush.bf16.msrb.mxu2 %v1574_v50  ;;  %707 = vmatmul.bf16.vlgmr.msra.gmra.mxu3 %v2185_v4  ;;  %v1780_v27 = vld [vmem:[%s2656_s1 + $0x234] sm:$0xf0]  ;;  %v1715_v28 = vld [vmem:[%s2656_s1 + $0x34] sm:$0xf]  ;;  %v1215_v29 = vld [vmem:[%s2656_s1 + $0x38] sm:$0xf0]  ;;  %v1290_v32 = vor.u32 %v1733_v24, %v1287_v25 }
  0x26   :  { %751 = vmatpush.bf16.msrb.mxu3 %v1250_v44  ;;  %681 = vmatmul.bf16.vlgmr.msra.gmra.mxu1 %v2187_v5  ;;  %v1533_v31 = vld [vmem:[%s2656_s1 + $0x2b0] sm:$0xf]  ;;  %v1796_v33 = vld [vmem:[%s2656_s1 + $0x2b4] sm:$0xf0]  ;;  %v1731_v34 = vld [vmem:[%s2656_s1 + $0xb4] sm:$0xf]  ;;  %v1470_v36 = vor.u32 %v1780_v27, %v1469_v26  ;;  %v1218_v37 = vor.u32 %v1715_v28, %v1215_v29 }
  0x27   :  { %725 = vmatpush.bf16.msrb.mxu1 %v1566_v53  ;;  %v35_v35 = vld [vmem:[%s2655_s0 + $0x8] sm:$0x3f]  ;;  %v1279_v38 = vld [vmem:[%s2656_s1 + $0xb8] sm:$0xf0]  ;;  %v1461_v39 = vld [vmem:[%s2656_s1 + $0x220] sm:$0xf]  ;;  %v1534_v43 = vor.u32 %v1796_v33, %v1533_v31 }
  0x28   :  { %713 = vmatpush.bf16.msrb.mxu0 %v1494_v60  ;;  %40 = vst [vmem:[#allocation1 + $0x20] ss:$4 sm:$0xff] %v35_v35  ;;  %v1778_v40 = vld [vmem:[%s2656_s1 + $0x224] sm:$0xf0]  ;;  %v1713_v41 = vld [vmem:[%s2656_s1 + $0x24] sm:$0xf]  ;;  %v1282_v44 = vor.u32 %v1731_v34, %v1279_v38 }
  0x29   :  { %764 = vmatpush.bf16.msra.mxu2 %v1314_v56  ;;  %v1207_v42 = vld [vmem:[%s2656_s1 + $0x28] sm:$0xf0]  ;;  %v1525_v45 = vld [vmem:[%s2656_s1 + $0x2a0] sm:$0xf]  ;;  %v1794_v46 = vld [vmem:[%s2656_s1 + $0x2a4] sm:$0xf0]  ;;  %v1462_v48 = vor.u32 %v1778_v40, %v1461_v39 }
  0x2a   :  { %752 = vmatpush.bf16.msrb.mxu3 %v1242_v61  ;;  %v1729_v47 = vld [vmem:[%s2656_s1 + $0xa4] sm:$0xf]  ;;  %v1210_v49 = vor.u32 %v1713_v41, %v1207_v42  ;;  %v1271_v50 = vld [vmem:[%s2656_s1 + $0xa8] sm:$0xf0]  ;;  %v1453_v51 = vld [vmem:[%s2656_s1 + $0x210] sm:$0xf]  ;;  %v1526_v57 = vor.u32 %v1794_v46, %v1525_v45 }
  0x2b   :  { %726 = vmatpush.bf16.msrb.mxu1 %v1558_v6  ;;  %v1776_v53 = vld [vmem:[%s2656_s1 + $0x214] sm:$0xf0]  ;;  %v1711_v54 = vld [vmem:[%s2656_s1 + $0x14] sm:$0xf]  ;;  %v1199_v55 = vld [vmem:[%s2656_s1 + $0x18] sm:$0xf0]  ;;  %v1274_v62 = vor.u32 %v1729_v47, %v1271_v50 }
  0x2c   :  { %714 = vmatpush.bf16.msrb.mxu0 %v1486_v10  ;;  %v1517_v56 = vld [vmem:[%s2656_s1 + $0x290] sm:$0xf]  ;;  %v1792_v59 = vld [vmem:[%s2656_s1 + $0x294] sm:$0xf0]  ;;  %v1727_v60 = vld [vmem:[%s2656_s1 + $0x94] sm:$0xf]  ;;  %v1454_v1 = vor.u32 %v1776_v53, %v1453_v51  ;;  %v1202_v2 = vor.u32 %v1711_v54, %v1199_v55 }
  0x2d   :  { %765 = vmatpush.bf16.msra.mxu2 %v1306_v7  ;;  %v1263_v61 = vld [vmem:[%s2656_s1 + $0x98] sm:$0xf0]  ;;  %v1445_v63 = vld [vmem:[%s2656_s1 + $0x200] sm:$0xf]  ;;  %v1774_v3 = vld [vmem:[%s2656_s1 + $0x204] sm:$0xf0]  ;;  %v1518_v12 = vor.u32 %v1792_v59, %v1517_v56 }
  0x2e   :  { %753 = vmatpush.bf16.msrb.mxu3 %v1234_v11  ;;  %v1709_v7 = vld [vmem:[%s2656_s1 + $0x4] sm:$0xf]  ;;  %v1191_v8 = vld [vmem:[%s2656_s1 + $0x8] sm:$0xf0]  ;;  %v1755_v9 = vld [vmem:[%s2656_s1 + $0x174] sm:$0xf]  ;;  %v1266_v16 = vor.u32 %v1727_v60, %v1263_v61  ;;  %v1446_v20 = vor.u32 %v1774_v3, %v1445_v63 }
  0x2f   :  { %727 = vmatpush.bf16.msrb.mxu1 %v1550_v18  ;;  %v47_v0 = vld.sshfl [vmem:[#allocation1 + $0x30] sm:$0xff pattern:$0x73625140]  ;;  %v1375_v10 = vld [vmem:[%s2656_s1 + $0x178] sm:$0xf0]  ;;  %v1194_v21 = vor.u32 %v1709_v7, %v1191_v8 }
  0x30   :  { %715 = vmatpush.bf16.msrb.mxu0 %v1478_v22  ;;  %v2310_v6 = vpack.c.bf16 %v47_v0, %v47_v0  ;;  %v1787_v11 = vld [vmem:[%s2656_s1 + $0x274] sm:$0xf]  ;;  %v1503_v13 = vld [vmem:[%s2656_s1 + $0x278] sm:$0xf0]  ;;  %v1509_v14 = vld [vmem:[%s2656_s1 + $0x280] sm:$0xf]  ;;  %v1378_v24 = vor.u32 %v1755_v9, %v1375_v10 }
  0x31   :  { %766 = vmatpush.bf16.msra.mxu2 %v1298_v19  ;;  %v1790_v15 = vld [vmem:[%s2656_s1 + $0x284] sm:$0xf0]  ;;  %v1725_v17 = vld [vmem:[%s2656_s1 + $0x84] sm:$0xf]  ;;  %v1255_v18 = vld [vmem:[%s2656_s1 + $0x88] sm:$0xf0]  ;;  %v1506_v25 = vor.u32 %v1787_v11, %v1503_v13 }
  0x32   :  { %754 = vmatpush.bf16.msrb.mxu3 %v1226_v23  ;;  %v1771_v19 = vld [vmem:[%s2656_s1 + $0x1f4] sm:$0xf]  ;;  %v45_v22 = vld.sshfl [vmem:[#allocation1 + $0x20] sm:$0xff pattern:$0x73625140]  ;;  %v1510_v29 = vor.u32 %v1790_v15, %v1509_v14  ;;  %v1258_v33 = vor.u32 %v1725_v17, %v1255_v18 }
  0x33   :  { %728 = vmatpush.bf16.msrb.mxu1 %v1542_v30  ;;  %v1439_v23 = vld [vmem:[%s2656_s1 + $0x1f8] sm:$0xf0]  ;;  %v1803_v26 = vld [vmem:[%s2656_s1 + $0x2f4] sm:$0xf]  ;;  %v1753_v28 = vld [vmem:[%s2656_s1 + $0x164] sm:$0xf] }
  0x34   :  { %716 = vmatpush.bf16.msrb.mxu0 %v1470_v36  ;;  %1579 = vmatmul.msk.bf16.vlgmr.msrb.gmra.mxu2 %vm656_vm0, %v2310_v6  ;;  %v1567_v27 = vld [vmem:[%s2656_s1 + $0x2f8] sm:$0xf0]  ;;  %v46_v30 = vld.sshfl [vmem:[#allocation1 + $0x28] sm:$0xff pattern:$0x73625140]  ;;  %v1442_v36 = vor.u32 %v1771_v19, %v1439_v23 }
  0x35   :  { %767 = vmatpush.bf16.msra.mxu2 %v1290_v32  ;;  %v1367_v31 = vld [vmem:[%s2656_s1 + $0x168] sm:$0xf0]  ;;  %v2362_v32 = vpack.c.bf16 %v45_v22, %v45_v22  ;;  %v1785_v34 = vld [vmem:[%s2656_s1 + $0x264] sm:$0xf]  ;;  %v2373_v39 = vpack.c.bf16 %v46_v30, %v46_v30  ;;  %v1751_v45 = vld [vmem:[%s2656_s1 + $0x154] sm:$0xf] }
  0x36   :  { %755 = vmatpush.bf16.msrb.mxu3 %v1218_v37  ;;  %v1495_v35 = vld [vmem:[%s2656_s1 + $0x268] sm:$0xf0]  ;;  %v1570_v37 = vor.u32 %v1803_v26, %v1567_v27  ;;  %v1769_v38 = vld [vmem:[%s2656_s1 + $0x1e4] sm:$0xf]  ;;  %v1370_v40 = vor.u32 %v1753_v28, %v1367_v31  ;;  %v1359_v46 = vld [vmem:[%s2656_s1 + $0x158] sm:$0xf0] }
  0x37   :  { %729 = vmatpush.bf16.msrb.mxu1 %v1534_v43  ;;  %v1431_v41 = vld [vmem:[%s2656_s1 + $0x1e8] sm:$0xf0]  ;;  %v1801_v42 = vld [vmem:[%s2656_s1 + $0x2e4] sm:$0xf]  ;;  %v1783_v47 = vld [vmem:[%s2656_s1 + $0x254] sm:$0xf]  ;;  %v1362_v53 = vor.u32 %v1751_v45, %v1359_v46 }
  0x38   :  { %717 = vmatpush.bf16.msrb.mxu0 %v1462_v48  ;;  %v1559_v43 = vld [vmem:[%s2656_s1 + $0x2e8] sm:$0xf0]  ;;  %v1487_v48 = vld [vmem:[%s2656_s1 + $0x258] sm:$0xf0]  ;;  %v1767_v51 = vld [vmem:[%s2656_s1 + $0x1d4] sm:$0xf] }
  0x39   :  { %768 = vmatpush.bf16.msra.mxu2 %v1282_v44  ;;  %v1498_v44 = vor.u32 %v1785_v34, %v1495_v35  ;;  %v1562_v50 = vor.u32 %v1801_v42, %v1559_v43  ;;  %v1423_v54 = vld [vmem:[%s2656_s1 + $0x1d8] sm:$0xf0]  ;;  %v1799_v55 = vld [vmem:[%s2656_s1 + $0x2d4] sm:$0xf]  ;;  %v1749_v59 = vld [vmem:[%s2656_s1 + $0x144] sm:$0xf] }
  0x3a   :  { %756 = vmatpush.bf16.msrb.mxu3 %v1210_v49  ;;  %v1434_v49 = vor.u32 %v1769_v38, %v1431_v41  ;;  %v1551_v56 = vld [vmem:[%s2656_s1 + $0x2d8] sm:$0xf0]  ;;  %v1351_v60 = vld [vmem:[%s2656_s1 + $0x148] sm:$0xf0]  ;;  %v1781_v61 = vld [vmem:[%s2656_s1 + $0x244] sm:$0xf]  ;;  %v1426_v0 = vor.u32 %v1767_v51, %v1423_v54 }
  0x3b   :  { %730 = vmatpush.bf16.msrb.mxu1 %v1526_v57  ;;  %v1490_v57 = vor.u32 %v1783_v47, %v1487_v48  ;;  %v1765_v63 = vld [vmem:[%s2656_s1 + $0x1c4] sm:$0xf]  ;;  %v1354_v7 = vor.u32 %v1749_v59, %v1351_v60  ;;  %v1747_v8 = vld [vmem:[%s2656_s1 + $0x134] sm:$0xf]  ;;  %v1343_v9 = vld [vmem:[%s2656_s1 + $0x138] sm:$0xf0] }
  0x3c   :  { %718 = vmatpush.bf16.msrb.mxu0 %v1454_v1  ;;  %v1554_v1 = vor.u32 %v1799_v55, %v1551_v56  ;;  %v1797_v3 = vld [vmem:[%s2656_s1 + $0x2c4] sm:$0xf] }
  0x3d   :  { %769 = vmatpush.bf16.msra.mxu2 %v1274_v62  ;;  %v1479_v62 = vld [vmem:[%s2656_s1 + $0x248] sm:$0xf0] }
  0x3e   :  { %757 = vmatpush.bf16.msrb.mxu3 %v1202_v2  ;;  %v1415_v2 = vld [vmem:[%s2656_s1 + $0x1c8] sm:$0xf0]  ;;  %v1482_v10 = vor.u32 %v1781_v61, %v1479_v62 }
  0x3f   :  { %731 = vmatpush.bf16.msrb.mxu1 %v1518_v12 }
  0x40   :  { %719 = vmatpush.bf16.msrb.mxu0 %v1446_v20 }
  0x41   :  { %770 = vmatpush.bf16.msra.mxu2 %v1266_v16 }
  0x42   :  { %758 = vmatpush.bf16.msrb.mxu3 %v1194_v21 }
  0x43   :  { %732 = vmatpush.bf16.msrb.mxu1 %v1510_v29  ;;  %720 = vmatmul.bf16.vlgmr.msrb.gmra.mxu0 %v2362_v32 }
  0x44   :  { %777 = vmatpush.bf16.msra.mxu0 %v1378_v24 }
  0x45   :  { %771 = vmatpush.bf16.msra.mxu2 %v1258_v33  ;;  %759 = vmatmul.bf16.vlgmr.msrb.gmra.mxu3 %v2165_v58  ;;  %v1543_v58 = vld [vmem:[%s2656_s1 + $0x2c8] sm:$0xf0] }
  0x46   :  { %803 = vmatpush.bf16.msra.mxu3 %v1506_v25  ;;  %733 = vmatmul.bf16.vlgmr.msrb.gmra.mxu1 %v2373_v39 }
  0x47   :  { %790 = vmatpush.bf16.msra.mxu1 %v1442_v36 }
  0x48   :  { %778 = vmatpush.bf16.msra.mxu0 %v1370_v40  ;;  %772 = vmatmul.bf16.vlgmr.msra.gmra.mxu2 %v2187_v5 }
  0x49   :  { %816 = vmatpush.bf16.msrb.mxu2 %v1570_v37 }
  0x4a   :  { %804 = vmatpush.bf16.msra.mxu3 %v1498_v44 }
  0x4b   :  { %791 = vmatpush.bf16.msra.mxu1 %v1434_v49 }
  0x4c   :  { %779 = vmatpush.bf16.msra.mxu0 %v1362_v53 }
  0x4d   :  { %817 = vmatpush.bf16.msrb.mxu2 %v1562_v50 }
  0x4e   :  { %805 = vmatpush.bf16.msra.mxu3 %v1490_v57 }
  0x4f   :  { %14 = vsyncpa [#allocation3], 0  ;;  %v1779_v11 = vld [vmem:[%s2656_s1 + $0x234] sm:$0xf]  ;;  %v1471_v12 = vld [vmem:[%s2656_s1 + $0x238] sm:$0xf0]  ;;  %792 = vmatpush.bf16.msra.mxu1 %v1426_v0  ;;  %v1418_v13 = vor.u32 %v1765_v63, %v1415_v2  ;;  %v1546_v14 = vor.u32 %v1797_v3, %v1543_v58  ;;  %v1346_v16 = vor.u32 %v1747_v8, %v1343_v9 }
  0x50   :  { %v1763_v15 = vld [vmem:[%s2656_s1 + $0x1b4] sm:$0xf]  ;;  %780 = vmatpush.bf16.msra.mxu0 %v1354_v7  ;;  %v1407_v5 = vld [vmem:[%s2656_s1 + $0x1b8] sm:$0xf0]  ;;  %v1474_v19 = vor.u32 %v1779_v11, %v1471_v12  ;;  %v1745_v20 = vld [vmem:[%s2656_s1 + $0x124] sm:$0xf] }
  0x51   :  { %818 = vmatpush.bf16.msrb.mxu2 %v1554_v1  ;;  %v1795_v17 = vld [vmem:[%s2656_s1 + $0x2b4] sm:$0xf]  ;;  %v1535_v18 = vld [vmem:[%s2656_s1 + $0x2b8] sm:$0xf0]  ;;  %v1335_v21 = vld [vmem:[%s2656_s1 + $0x128] sm:$0xf0]  ;;  %v1410_v24 = vor.u32 %v1763_v15, %v1407_v5 }
  0x52   :  { %806 = vmatpush.bf16.msra.mxu3 %v1482_v10  ;;  %v1777_v22 = vld [vmem:[%s2656_s1 + $0x224] sm:$0xf]  ;;  %v1463_v23 = vld [vmem:[%s2656_s1 + $0x228] sm:$0xf0]  ;;  %v1538_v25 = vor.u32 %v1795_v17, %v1535_v18  ;;  %v1338_v27 = vor.u32 %v1745_v20, %v1335_v21  ;;  %v1743_v33 = vld [vmem:[%s2656_s1 + $0x114] sm:$0xf] }
  0x53   :  { %793 = vmatpush.bf16.msra.mxu1 %v1418_v13  ;;  %v1761_v26 = vld [vmem:[%s2656_s1 + $0x1a4] sm:$0xf]  ;;  %v1399_v28 = vld [vmem:[%s2656_s1 + $0x1a8] sm:$0xf0]  ;;  %v1466_v31 = vor.u32 %v1777_v22, %v1463_v23  ;;  %v1327_v34 = vld [vmem:[%s2656_s1 + $0x118] sm:$0xf0] }
  0x54   :  { %781 = vmatpush.bf16.msra.mxu0 %v1346_v16  ;;  %v1793_v29 = vld [vmem:[%s2656_s1 + $0x2a4] sm:$0xf]  ;;  %v1527_v30 = vld [vmem:[%s2656_s1 + $0x2a8] sm:$0xf0]  ;;  %v1775_v35 = vld [vmem:[%s2656_s1 + $0x214] sm:$0xf]  ;;  %v1402_v37 = vor.u32 %v1761_v26, %v1399_v28  ;;  %v1330_v41 = vor.u32 %v1743_v33, %v1327_v34 }
  0x55   :  { %819 = vmatpush.bf16.msrb.mxu2 %v1546_v14  ;;  %v1455_v36 = vld [vmem:[%s2656_s1 + $0x218] sm:$0xf0]  ;;  %v1530_v38 = vor.u32 %v1793_v29, %v1527_v30  ;;  %v1759_v40 = vld [vmem:[%s2656_s1 + $0x194] sm:$0xf]  ;;  %v1741_v46 = vld [vmem:[%s2656_s1 + $0x104] sm:$0xf] }
  0x56   :  { %807 = vmatpush.bf16.msra.mxu3 %v1474_v19  ;;  %v1391_v42 = vld [vmem:[%s2656_s1 + $0x198] sm:$0xf0]  ;;  %v1791_v43 = vld [vmem:[%s2656_s1 + $0x294] sm:$0xf]  ;;  %v1458_v45 = vor.u32 %v1775_v35, %v1455_v36  ;;  %v1319_v47 = vld [vmem:[%s2656_s1 + $0x108] sm:$0xf0] }
  0x57   :  { %794 = vmatpush.bf16.msra.mxu1 %v1410_v24  ;;  %v1519_v44 = vld [vmem:[%s2656_s1 + $0x298] sm:$0xf0]  ;;  %v1773_v48 = vld [vmem:[%s2656_s1 + $0x204] sm:$0xf]  ;;  %v1447_v49 = vld [vmem:[%s2656_s1 + $0x208] sm:$0xf0]  ;;  %v1394_v53 = vor.u32 %v1759_v40, %v1391_v42  ;;  %v1322_v55 = vor.u32 %v1741_v46, %v1319_v47 }
  0x58   :  { %782 = vmatpush.bf16.msra.mxu0 %v1338_v27  ;;  %v1805_v50 = vld [vmem:[%s2656_s1 + $0x304] sm:$0xf]  ;;  %v1575_v51 = vld [vmem:[%s2656_s1 + $0x308] sm:$0xf0]  ;;  %v1522_v54 = vor.u32 %v1791_v43, %v1519_v44  ;;  %v1450_v59 = vor.u32 %v1773_v48, %v1447_v49  ;;  %v1814_v1 = vld [vmem:[%s2658_s3 + $0x38] sm:$0xff]  ;;  %s1869_s16 = smov [#allocation2]  }
  0x59   :  { %820 = vmatpush.bf16.msrb.mxu2 %v1538_v25  ;;  %v1757_v56 = vld [vmem:[%s2656_s1 + $0x184] sm:$0xf]  ;;  %v1383_v57 = vld [vmem:[%s2656_s1 + $0x188] sm:$0xf0]  ;;  %v1578_v62 = vor.u32 %v1805_v50, %v1575_v51  ;;  %v1813_v2 = vld [vmem:[%s2658_s3 + $0x30] sm:$0xff]  ;;  %s1176_s17 = sshll.u32 %s1869_s16, 4  ;;  %s1177_s17 = int_to_ptr.vmem [resolvable:$true] %s1176_s17 }
  0x5a   :  { %808 = vmatpush.bf16.msra.mxu3 %v1466_v31  ;;  %v1789_v60 = vld [vmem:[%s2656_s1 + $0x284] sm:$0xf]  ;;  %v1511_v61 = vld [vmem:[%s2656_s1 + $0x288] sm:$0xf0]  ;;  %v1386_v63 = vor.u32 %v1757_v56, %v1383_v57  ;;  %v160_v9 = vld [vmem:[%s2657_s2] sm:$0x3] }
  0x5b   :  { %795 = vmatpush.bf16.msra.mxu1 %v1402_v37  ;;  %v1514_v0 = vor.u32 %v1789_v60, %v1511_v61  ;;  %v1807_v7 = vld [vmem:[%s2658_s3] sm:$0xff]  ;;  %v1822_v13 = vld [vmem:[%s2658_s3 + $0x78] sm:$0xff]  ;;  %v162_v14 = vperm.slane %v160_v9, 0  ;;  %v1821_v16 = vld [vmem:[%s2658_s3 + $0x70] sm:$0xff]  ;;  %v163_v44 = vperm.slane %v160_v9, 1 }
  0x5c   :  { %783 = vmatpush.bf16.msra.mxu0 %v1330_v41  ;;  %v1820_v20 = vld [vmem:[%s2658_s3 + $0x68] sm:$0xff]  ;;  %v1819_v24 = vld [vmem:[%s2658_s3 + $0x60] sm:$0xff]  ;;  %v1818_v28 = vld [vmem:[%s2658_s3 + $0x58] sm:$0xff] }
  0x5d   :  { %821 = vmatpush.bf16.msrb.mxu2 %v1530_v38  ;;  %v1817_v34 = vld [vmem:[%s2658_s3 + $0x50] sm:$0xff]  ;;  %v1816_v38 = vld [vmem:[%s2658_s3 + $0x48] sm:$0xff]  ;;  %v1815_v41 = vld [vmem:[%s2658_s3 + $0x40] sm:$0xff] }
  0x5e   :  { %809 = vmatpush.bf16.msra.mxu3 %v1458_v45  ;;  %v1838_v9 = vld [vmem:[%s2662_s7 + $0x38] sm:$0xff] }
  0x5f   :  { %796 = vmatpush.bf16.msra.mxu1 %v1394_v53 }
  0x60   :  { %784 = vmatpush.bf16.msra.mxu0 %v1322_v55 }
  0x61   :  { %822 = vmatpush.bf16.msrb.mxu2 %v1522_v54 }
  0x62   :  { %810 = vmatpush.bf16.msra.mxu3 %v1450_v59 }
  0x63   :  { %797 = vmatpush.bf16.msra.mxu1 %v1386_v63  ;;  %785 = vmatmul.bf16.vlgmr.msra.gmra.mxu0 %v2157_v52  ;;  %v1812_v52 = vld [vmem:[%s2658_s3 + $0x28] sm:$0xff] }
  0x64   :  { %836 = vmatpush.bf16.msrb.mxu0 %v1578_v62 }
  0x65   :  { %811 = vmatmul.bf16.vlgmr.msra.gmra.mxu3 %v2362_v32  ;;  %823 = vmatpush.bf16.msrb.mxu2 %v1514_v0  ;;  %v1809_v32 = vld [vmem:[%s2658_s3 + $0x10] sm:$0xff] }
  0x66   :  { %798 = vmatmul.bf16.vlgmr.msra.gmra.mxu1 %v2185_v4  ;;  %v1811_v4 = vld [vmem:[%s2658_s3 + $0x20] sm:$0xff]  ;;  %991 = vmatpush.bf16.msrb.mxu3 %v1822_v13  ;;  %v1834_v13 = vld [vmem:[%s2662_s7 + $0x18] sm:$0xff] }
  0x67   :  { %978 = vmatpush.bf16.msrb.mxu1 %v1814_v1 }
  0x68   :  { %824 = vmatmul.bf16.vlgmr.msrb.gmra.mxu2 %v2373_v39  ;;  %v1808_v39 = vld [vmem:[%s2658_s3 + $0x8] sm:$0xff] }
  0x69   :  { %1157 = vmatpush.bf16.msra.mxu2 %v1838_v9 }
  0x6a   :  { %992 = vmatpush.bf16.msrb.mxu3 %v1821_v16 }
  0x6b   :  { %979 = vmatpush.bf16.msrb.mxu1 %v1813_v2  ;;  %v1830_v2 = vld [vmem:[%s2660_s5 + $0x38] sm:$0xff] }
  0x6c   :  { %1074 = vmatpush.bf16.msra.mxu0 %v1830_v2 }
  0x6e   :  { %993 = vmatpush.bf16.msrb.mxu3 %v1820_v20 }
  0x6f   :  { %980 = vmatpush.bf16.msrb.mxu1 %v1812_v52  ;;  %v1829_v52 = vld [vmem:[%s2660_s5 + $0x30] sm:$0xff] }
  0x70   :  { %1075 = vmatpush.bf16.msra.mxu0 %v1829_v52 }
  0x72   :  { %994 = vmatpush.bf16.msrb.mxu3 %v1819_v24 }
  0x73   :  { %1580 = vmatmul.msk.bf16.vlgmr.msrb.gmra.mxu0 %vm656_vm0, %v2310_v6  ;;  %981 = vmatpush.bf16.msrb.mxu1 %v1811_v4  ;;  %v1810_v6 = vld [vmem:[%s2658_s3 + $0x18] sm:$0xff]  ;;  %v1828_v4 = vld [vmem:[%s2660_s5 + $0x28] sm:$0xff] }
  0x74   :  { %1076 = vmatpush.bf16.msra.mxu0 %v1828_v4 }
  0x76   :  { %995 = vmatpush.bf16.msrb.mxu3 %v1818_v28 }
  0x77   :  { %982 = vmatpush.bf16.msrb.mxu1 %v1810_v6  ;;  %v1827_v6 = vld [vmem:[%s2660_s5 + $0x20] sm:$0xff] }
  0x78   :  { %1077 = vmatpush.bf16.msra.mxu0 %v1827_v6 }
  0x7a   :  { %996 = vmatpush.bf16.msrb.mxu3 %v1817_v34 }
  0x7b   :  { %983 = vmatpush.bf16.msrb.mxu1 %v1809_v32  ;;  %v1826_v32 = vld [vmem:[%s2660_s5 + $0x18] sm:$0xff] }
  0x7c   :  { %1078 = vmatpush.bf16.msra.mxu0 %v1826_v32 }
  0x7e   :  { %997 = vmatpush.bf16.msrb.mxu3 %v1816_v38 }
  0x7f   :  { %984 = vmatpush.bf16.msrb.mxu1 %v1808_v39  ;;  %v1825_v39 = vld [vmem:[%s2660_s5 + $0x10] sm:$0xff] }
  0x80   :  { %1079 = vmatpush.bf16.msra.mxu0 %v1825_v39 }
  0x82   :  { %998 = vmatpush.bf16.msrb.mxu3 %v1815_v41 }
  0x83   :  { %985 = vmatpush.bf16.msrb.mxu1 %v1807_v7  ;;  %v1824_v7 = vld [vmem:[%s2660_s5 + $0x8] sm:$0xff] }
  0x84   :  { %1080 = vmatpush.bf16.msra.mxu0 %v1824_v7 }
  0xa0   :  { %v669_v3 = vpop.f32.mrf.mxu0 }
  0xa1   :  { %v670_v5 = vadd.f32 %v669_v3, %v162_v14  ;;  %v1833_v14 = vld [vmem:[%s2662_s7 + $0x10] sm:$0xff] }
  0xa3   :  { %v682_v58 = vpop.f32.mrf.mxu1 }
  0xa4   :  { %v683_v18 = vadd.f32 %v682_v58, %v670_v5 }
  0xa7   :  { %v695_v8 = vpop.f32.mrf.mxu2 }
  0xa8   :  { %v708_v10 = vpop.f32.mrf.mxu3  ;;  %v671_v11 = vpop.f32.mrf.mxu0  ;;  %v696_v19 = vadd.f32 %v695_v8, %v683_v18  ;;  %v1823_v8 = vld [vmem:[%s2660_s5] sm:$0xff] }
  0xa9   :  { %1081 = vmatpush.bf16.msra.mxu0 %v1823_v8  ;;  %v1836_v11 = vld [vmem:[%s2662_s7 + $0x28] sm:$0xff] }
  0xaa   :  { %v709_v22 = vadd.f32 %v708_v10, %v696_v19  ;;  %v1837_v10 = vld [vmem:[%s2662_s7 + $0x30] sm:$0xff] }
  0xab   :  { %v684_v12 = vpop.f32.mrf.mxu1  ;;  %1158 = vmatpush.bf16.msra.mxu2 %v1837_v10 }
  0xac   :  { %v1835_v12 = vld [vmem:[%s2662_s7 + $0x20] sm:$0xff] }
  0xaf   :  { %v697_v15 = vpop.f32.mrf.mxu2  ;;  %1159 = vmatpush.bf16.msra.mxu2 %v1836_v11 }
  0xb0   :  { %v710_v17 = vpop.f32.mrf.mxu3  ;;  %v1840_v15 = vld [vmem:[%s2659_s4] ss:$0 sm:$0xff] }
  0xb3   :  { %1160 = vmatpush.bf16.msra.mxu2 %v1835_v12 }
  0xb7   :  { %v747_v21 = vpop.f32.mrf.mxu2  ;;  %1161 = vmatpush.bf16.msra.mxu2 %v1834_v13 }
  0xbb   :  { %1162 = vmatpush.bf16.msra.mxu2 %v1833_v14 }
  0xbf   :  { %v749_v30 = vpop.f32.mrf.mxu2 }
  0xc0   :  { %v721_v23 = vpop.f32.mrf.mxu0 }
  0xc1   :  { %v722_v25 = vadd.f32 %v721_v23, %v709_v22  ;;  %v1831_v22 = vld [vmem:[%s2662_s7] sm:$0xff] }
  0xc2   :  { %v1841_v23 = vld [vmem:[%s2661_s6] ss:$0 sm:$0xff] }
  0xc3   :  { %v734_v26 = vpop.f32.mrf.mxu1 }
  0xc4   :  { %v735_v27 = vadd.f32 %v734_v26, %v722_v25 }
  0xc6   :  { %v748_v29 = vadd.f32 %v747_v21, %v735_v27  ;;  %v1832_v21 = vld [vmem:[%s2662_s7 + $0x8] sm:$0xff]  ;;  %s1178_s7 = sshll.u32 %s2664_s9, 4  ;;  %s1179_s7 = int_to_ptr.hbm [resolvable:$true] %s1178_s7 }
  0xc7   :  { %1163 = vmatpush.bf16.msra.mxu2 %v1832_v21 }
  0xc8   :  { %v842_v31 = vmax.f32 %v748_v29, 0.0  ;;  %v723_v33 = vpop.f32.mrf.mxu0  ;;  %v760_v36 = vpop.f32.mrf.mxu3  ;;  %v1842_v29 = vld [vmem:[%s2663_s8] ss:$0 sm:$0xff] }
  0xc9   :  { %v761_v45 = vadd.f32 %v760_v36, %v163_v44 }
  0xca   :  { %v844_v35 = vpack.c.bf16 %v842_v31, %v842_v31 }
  0xcb   :  { %v736_v37 = vpop.f32.mrf.mxu1  ;;  %v773_v40 = vpop.f32.mrf.mxu2  ;;  %1164 = vmatpush.bf16.msra.mxu2 %v1831_v22 }
  0xcc   :  { %986 = vmatmul.bf16.vlgmr.msrb.gmra.mxu1 %v844_v35  ;;  %v774_v47 = vadd.f32 %v773_v40, %v761_v45 }
  0xd0   :  { %v762_v42 = vpop.f32.mrf.mxu3 }
  0xd3   :  { %v775_v43 = vpop.f32.mrf.mxu2 }
  0xe0   :  { %v786_v46 = vpop.f32.mrf.mxu0 }
  0xe1   :  { %v787_v49 = vadd.f32 %v786_v46, %v774_v47 }
  0xe3   :  { %v799_v48 = vpop.f32.mrf.mxu1 }
  0xe4   :  { %v800_v53 = vadd.f32 %v799_v48, %v787_v49 }
  0xe8   :  { %v812_v50 = vpop.f32.mrf.mxu3  ;;  %v788_v51 = vpop.f32.mrf.mxu0 }
  0xe9   :  { %v813_v55 = vadd.f32 %v812_v50, %v800_v53 }
  0xeb   :  { %v825_v54 = vpop.f32.mrf.mxu2  ;;  %v801_v56 = vpop.f32.mrf.mxu1 }
  0xec   :  { %v826_v57 = vadd.f32 %v825_v54, %v813_v55 }
  0xf0   :  { %v814_v59 = vpop.f32.mrf.mxu3  ;;  %v838_v60 = vpop.f32.mrf.mxu0 }
  0xf1   :  { %v839_v61 = vadd.f32 %v838_v60, %v826_v57 }
  0xf3   :  { %v827_v62 = vpop.f32.mrf.mxu2  ;;  %v843_v63 = vmax.f32 %v839_v61, 0.0 }
  0xf5   :  { %v845_v0 = vpack.c.bf16 %v843_v63, %v843_v63 }
  0xf7   :  { %999 = vmatmul.bf16.vlgmr.msrb.gmra.mxu3 %v845_v0 }
  0xf8   :  { %v840_v1 = vpop.f32.mrf.mxu0 }
 0x149   :  { %v987_v3 = vpop.f32.mrf.mxu1 }
 0x14a   :  { %v988_v16 = vadd.f32 %v1840_v15, %v987_v3 }
 0x151   :  { %v989_v58 = vpop.f32.mrf.mxu1 }
 0x17a   :  { %v1000_v5 = vpop.f32.mrf.mxu3 }
 0x17b   :  { %v1001_v17 = vadd.f32 %v1000_v5, %v988_v16 }
 0x17d   :  { %v1004_v18 = vmax.f32 %v1001_v17, 0.0 }
 0x17f   :  { %v1005_v19 = vpack.c.bf16 %v1004_v18, %v1004_v18 }
 0x181   :  { %1082 = vmatmul.bf16.vlgmr.msra.gmra.mxu0 %v1005_v19 }
 0x182   :  { %v1002_v20 = vpop.f32.mrf.mxu3 }
 0x1fe   :  { %v1083_v24 = vpop.f32.mrf.mxu0 }
 0x1ff   :  { %v1084_v25 = vadd.f32 %v1841_v23, %v1083_v24 }
 0x201   :  { %v1087_v26 = vmax.f32 %v1084_v25, 0.0 }
 0x203   :  { %v1088_v27 = vpack.c.bf16 %v1087_v26, %v1087_v26 }
 0x205   :  { %1165 = vmatmul.bf16.vlgmr.msra.gmra.mxu2 %v1088_v27 }
 0x206   :  { %v1085_v28 = vpop.f32.mrf.mxu0 }
 0x288   :  { %v1166_v30 = vpop.f32.mrf.mxu2 }
 0x289   :  { %v1167_v31 = vadd.f32 %v1842_v29, %v1166_v30 }
 0x28b   :  { %1170 = vst [vmem:[#allocation2] sm:$0x3] %v1167_v31 }
 0x28c   :  { %1181 = dma.vmem_to_hbm [thread:$0]  %s1177_s17, 32, %s1179_s7, [#allocation3]  }
 0x290   :  { %v1168_v33 = vpop.f32.mrf.mxu2 }
 0x291   :  { %1867 = dma.done.wait [#allocation3], 32  }
 0x292   :  { %1868 = vsyncadd [#allocation3], 4294967264 }
 0x293   :  { %1186 = vsyncpa [#allocation3], 1 }

</bundles_post_ra>
